<compile_context>
chip_gen: v7x
topology: tpu7x:2x2x1
jax: 0.10.0
libtpu: 0.0.40
codegen_flags: <defaults>
</compile_context>

<pallas_src>
import math

import jax
import jax.numpy as jnp
from jax.experimental import pallas as pl
from jax.experimental.pallas import tpu as pltpu


def _round_up(x: int, m: int) -> int:
    return ((x + m - 1) // m) * m


def _vmem_capacity_bytes(default: int = 64 * 1024 * 1024) -> int:
    # Generation-aware VMEM query (v5e/v6e: 128 MiB, v7x: 64 MiB per core).
    try:
        cap = getattr(pltpu.get_tpu_info(), "vmem_capacity_bytes", None)
        if cap:
            return int(cap)
    except Exception:
        pass
    return default  # conservative (v7x-sized) fallback


def _choose_band(f_phys: int, s: int, itemsize: int) -> int:
    """Column-band width: a multiple of s (whole diagonal blocks) and of 128
    (lane-dense blocks); smaller bands for f32 to keep the MXU off the
    critical path on v5e/v7x. Falls back to dense (f_phys) for odd sizes."""
    candidates = (256, 128) if itemsize >= 4 else (512, 384, 256, 128)
    for g in candidates:
        if f_phys % g == 0 and g % s == 0:
            return g
    return f_phys


def hc_block_kernel(x_ref, w_ref, b_ref, o_ref):
    # x_ref: (tm, G), w_ref: (1, G, G) block-diagonal band, b_ref: (1, G)
    y = jnp.dot(x_ref[...], w_ref[0], preferred_element_type=jnp.float32)
    o_ref[...] = (y + b_ref[...].astype(jnp.float32)).astype(o_ref.dtype)


def hypercube_block(x, w1, b1, w2, b2, *, tm=None):
    """Fused HyperCubeBlock forward. x: (B, C, F) with F a perfect square."""
    B, C, F = x.shape
    s = int(round(math.sqrt(F)))
    assert s * s == F, "in_features must be a perfect square"
    # The torch module's broadcast `x.movedim(1,2) @ weight` only type-checks
    # when out_sqrt_features == sqrt(in_features); enforce that explicitly.
    assert w1.shape == (s, s, s) and w2.shape == (s, s, s), (
        "HyperCubeBlock requires out_sqrt_features == sqrt(in_features)")
    assert b1.shape == (s,) and b2.shape == (s,)

    M = B * C
    itemsize = jnp.dtype(x.dtype).itemsize
    hp = jax.lax.Precision.HIGHEST

    # ---- one-time tiny (s^3) parameter fusion: two linears, no nonlinearity
    w12 = jnp.einsum("ijk,ikl->ijl", w1, w2, precision=hp)              # (s,s,s)
    b12 = jnp.einsum("j,ijk->ik", b1, w2, precision=hp) + b2[None, :]   # (s,s)

    # ---- lane packing for F < 128: pack several logical rows per physical row
    pack = 1
    if F < 128 and (128 % F == 0) and (M % (128 // F) == 0):
        pack = 128 // F
    M_phys = M // pack
    F_phys = F * pack

    # ---- column-band width and stacked block-diagonal band tiles -----------
    G = _choose_band(F_phys, s, itemsize)
    nb = F_phys // G          # number of diagonal band tiles along features
    nbk = G // s              # s-blocks per band tile
    nblk = F_phys // s        # total s-blocks along the packed feature axis

    w_blocks = w12[jnp.arange(nblk) % s].reshape(nb, nbk, s, s)
    eye = jnp.eye(nbk, dtype=w12.dtype)
    w_tiles = jnp.einsum("nljk,lm->nljmk", w_blocks, eye).reshape(nb, G, G)
    w_tiles = w_tiles.astype(x.dtype)                 # match x dtype (no promo)
    b_full = jnp.tile(b12.reshape(1, F), (1, pack)).astype(x.dtype)  # (1, F_phys)

    # ---- generation-aware row-tile sizing ----------------------------------
    vmem_cap = _vmem_capacity_bytes()
    data_budget = min(vmem_cap // 2, 48 * 1024 * 1024)   # x + out double buffers
    w_bufs = 1 if nb == 1 else 2
    w_bytes = w_bufs * G * G * itemsize
    if tm is None:
        tm = max(8, ((data_budget - w_bytes) // (4 * G * itemsize)) // 8 * 8)
        # keep >= 2 row tiles on non-trivial inputs so both v7x TCs get work
        if M_phys >= 16:
            tm = min(tm, _round_up(pl.cdiv(M_phys, 2), 8))
    tm = max(8, min(_round_up(tm, 8), _round_up(M_phys, 8)))
    grid = (pl.cdiv(M_phys, tm), nb)

    x2 = x.reshape(M_phys, F_phys)   # pure reshape: no transpose, no HBM pass

    if nb == 1:
        # Constant grid index: weight/bias loaded once, single-buffered.
        w_spec = pl.BlockSpec((1, G, G), lambda i, j: (0, 0, 0),
                              pipeline_mode=pl.Buffered(1))
        b_spec = pl.BlockSpec((1, G), lambda i, j: (0, 0),
                              pipeline_mode=pl.Buffered(1))
    else:
        w_spec = pl.BlockSpec((1, G, G), lambda i, j: (j, 0, 0))
        b_spec = pl.BlockSpec((1, G), lambda i, j: (0, j))

    vmem_use = 4 * tm * G * itemsize + w_bytes + 2 * G * itemsize
    vmem_limit = int(min(vmem_cap, max(vmem_use + (8 << 20), 32 << 20)))

    cost = pl.CostEstimate(
        flops=2 * M_phys * F_phys * G,
        transcendentals=0,
        bytes_accessed=2 * M * F * itemsize + (F_phys * G + F_phys) * itemsize,
    )

    out = pl.pallas_call(
        hc_block_kernel,
        out_shape=jax.ShapeDtypeStruct((M_phys, F_phys), x.dtype),
        grid=grid,
        in_specs=[
            pl.BlockSpec((tm, G), lambda i, j: (i, j)),   # x row/band tile
            w_spec,                                       # fused block-diag band
            b_spec,                                       # fused bias band
        ],
        out_specs=pl.BlockSpec((tm, G), lambda i, j: (i, j)),
        compiler_params=pltpu.CompilerParams(
            dimension_semantics=("parallel", "parallel"),
            vmem_limit_bytes=vmem_limit),
        cost_estimate=cost,
    )(x2, w_tiles, b_full)

    return out.reshape(B, C, F)


# ----------------------- pure-JAX reference (unfused, per torch spec) -------
def _layer_ref(x, w, b):
    B, C, F = x.shape
    s = w.shape[-1]
    xv = x.reshape(B, C, s, s)
    out = jnp.einsum("bcij,ijk->bcik", xv, w,
                     precision=jax.lax.Precision.HIGHEST) + b
    return out.reshape(B, C, F)


def hypercube_block_ref(x, w1, b1, w2, b2):
    return _layer_ref(_layer_ref(x, w1, b1), w2, b2)


if __name__ == "__main__":
    B, C, F = 2, 8, 64          # in_features = 64 -> s = 8, out_sqrt_features = 8
    s = int(math.sqrt(F))

    key = jax.random.PRNGKey(0)
    kx, kw1, kb1, kw2, kb2 = jax.random.split(key, 5)

    # Deterministic init mimicking kaiming_uniform_(a=sqrt(5)) bounds:
    # fan_in = s*s  ->  weight/bias bound = 1/sqrt(fan_in) = 1/s.
    bound = 1.0 / s
    x = jax.random.normal(kx, (B, C, F), dtype=jnp.float32)
    w1 = jax.random.uniform(kw1, (s, s, s), jnp.float32, -bound, bound)
    b1 = jax.random.uniform(kb1, (s,), jnp.float32, -bound, bound)
    w2 = jax.random.uniform(kw2, (s, s, s), jnp.float32, -bound, bound)
    b2 = jax.random.uniform(kb2, (s,), jnp.float32, -bound, bound)

    out = jax.block_until_ready(hypercube_block(x, w1, b1, w2, b2))
    ref = hypercube_block_ref(x, w1, b1, w2, b2)

    assert out.shape == (B, C, F)
    assert jnp.allclose(out, ref, atol=1e-5, rtol=1e-5), "mismatch vs reference"
    print("KERNEL_OK")
</pallas_src>

<mosaic_0001>
module attributes {stable_mosaic.version = 11 : i64} {
  func.func @hc_block_kernel(%arg0: i32, %arg1: i32, %arg2: memref<8x128xf32, #tpu.memory_space<vmem>>, %arg3: memref<1x128x128xf32, #tpu.memory_space<vmem>>, %arg4: memref<1x128xf32, #tpu.memory_space<vmem>>, %arg5: memref<8x128xf32, #tpu.memory_space<vmem>>) attributes {dimension_semantics = [#tpu.dimension_semantics<parallel>, #tpu.dimension_semantics<parallel>], iteration_bounds = array<i64: 1, 1>, scalar_prefetch = 0 : i64, scratch_operands = 0 : i64, tpu.core_type = #tpu.core_type<tc>, window_params = [{transform_indices = @transform_0, window_bounds = array<i64: 8, 128>}, {pipeline_mode = #tpu.pipeline_mode<synchronous>, transform_indices = @transform_1, window_bounds = array<i64: 1, 128, 128>}, {pipeline_mode = #tpu.pipeline_mode<synchronous>, transform_indices = @transform_2, window_bounds = array<i64: 1, 128>}, {transform_indices = @transform_3, window_bounds = array<i64: 8, 128>}]} {
    %c0 = arith.constant 0 : index
    %c0_0 = arith.constant 0 : index
    %0 = vector.load %arg2[%c0, %c0_0] : memref<8x128xf32, #tpu.memory_space<vmem>>, vector<8x128xf32>
    %c0_1 = arith.constant 0 : index
    %c0_2 = arith.constant 0 : index
    %c0_3 = arith.constant 0 : index
    %1 = vector.load %arg3[%c0_1, %c0_2, %c0_3] : memref<1x128x128xf32, #tpu.memory_space<vmem>>, vector<1x128x128xf32>
    %2 = vector.shape_cast %1 : vector<1x128x128xf32> to vector<128x128xf32>
    %cst = arith.constant dense<0.000000e+00> : vector<8x128xf32>
    %3 = tpu.matmul %0, %2, %cst {dimension_numbers = #tpu.dot_dimension_numbers<[1], [0], [0], [1], [0, 0, 1, 1], [], []>} : vector<8x128xf32>, vector<128x128xf32>, vector<8x128xf32> -> vector<8x128xf32>
    %c0_4 = arith.constant 0 : index
    %c0_5 = arith.constant 0 : index
    %4 = vector.load %arg4[%c0_4, %c0_5] : memref<1x128xf32, #tpu.memory_space<vmem>>, vector<1x128xf32>
    %5 = vector.broadcast %4 : vector<1x128xf32> to vector<8x128xf32>
    %6 = arith.addf %3, %5 : vector<8x128xf32>
    %c0_6 = arith.constant 0 : index
    %c0_7 = arith.constant 0 : index
    %7 = vector.load %arg5[%c0_6, %c0_7] : memref<8x128xf32, #tpu.memory_space<vmem>>, vector<8x128xf32>
    tpu.vector_store %arg5[%c0_6, %c0_7], %6 {strides = array<i32>} : memref<8x128xf32, #tpu.memory_space<vmem>>, vector<8x128xf32>,
    return
  }
  func.func @transform_0(%arg0: i32, %arg1: i32) -> (i32, i32) {
    %c0_i32 = arith.constant 0 : i32
    return %arg0, %arg1 : i32, i32
  }
  func.func @transform_1(%arg0: i32, %arg1: i32) -> (i32, i32, i32) {
    %c0_i32 = arith.constant 0 : i32
    %c0_i32_0 = arith.constant 0 : i32
    %c0_i32_1 = arith.constant 0 : i32
    %c0_i32_2 = arith.constant 0 : i32
    return %c0_i32, %c0_i32_0, %c0_i32_1 : i32, i32, i32
  }
  func.func @transform_2(%arg0: i32, %arg1: i32) -> (i32, i32) {
    %c0_i32 = arith.constant 0 : i32
    %c0_i32_0 = arith.constant 0 : i32
    %c0_i32_1 = arith.constant 0 : i32
    return %c0_i32, %c0_i32_0 : i32, i32
  }
  func.func @transform_3(%arg0: i32, %arg1: i32) -> (i32, i32) {
    %c0_i32 = arith.constant 0 : i32
    return %arg0, %arg1 : i32, i32
  }
}

</mosaic_0001>

<bundles_post_ra>
// kernel: tpu_custom_call.1
= control target key start
LH: loop header
LB: loop body
LE: loop exit
PB: predicated region body
PF: predicated region fallthrough
CT: control target
= control target key end

     0   :  { %8 = vsyncpa [#allocation3], 0  ;;  %s383_s0 = inlined_call_operand.hbm [shape: f32[8,128], index: 0, kind: input, shape index: {}]   ;;  %s384_s1 = inlined_call_operand.hbm [shape: f32[1,128,128], index: 1, kind: input, shape index: {}]   ;;  %s385_s2 = inlined_call_operand.vmem [shape: f32[1,128], index: 2, kind: input, shape index: {}]   ;;  %s386_s3 = inlined_call_operand.hbm [shape: f32[8,128], index: 3, kind: output, shape index: {}]  }
   0x1   :  { %9 = vsyncpa [#allocation6], 0 }
   0x2   :  { %10 = vsyncpa [#allocation4], 0  ;;  %s309_s12 = smov [#allocation2]   ;;  %s310_s14 = smov [#allocation5]  }
   0x3   :  { %s17_s13 = sshll.u32 %s309_s12, 4  ;;  %s26_s15 = sshll.u32 %s310_s14, 4  ;;  %s18_s13 = int_to_ptr.vmem [resolvable:$true] %s17_s13  ;;  %s337_s15 = int_to_ptr.vmem [resolvable:$true] %s26_s15 }
   0x4   :  { %s237_s18 = scalar_lea.hbm %s383_s0, 128 }
   0x5   :  { %p238_p0 = scmp.ne.s32.totalorder %s383_s0, %s237_s18  ;;  %p241_p1 = scmp.lt.u32.totalorder %s237_s18, %s383_s0 }
   0x7   :  { %p243_p2 = pnand %p241_p1, %p238_p0 }
   0x9   :  { %246 = shalt.err (!%p243_p2)
}
   0xa   :  { %s247_s23 = scalar_lea.vmem %s18_s13, 128  ;;  %p252_p4 = scmp.lt.s32.totalorder %s18_s13, %s18_s13 }
   0xb   :  { %p248_p3 = scmp.ne.s32.totalorder %s18_s13, %s247_s23  ;;  %p253_p5 = scmp.lt.s32.totalorder %s247_s23, %s247_s23 }
   0xd   :  { %p254_p6 = por %p253_p5, %p252_p4 }
   0xf   :  { %p255_p7 = pnand %p254_p6, %p248_p3 }
  0x11   :  { %258 = shalt.err (!%p255_p7)
}
  0x12   :  { %20 = dma.hbm_to_vmem [thread:$0]  %s383_s0, 128, %s18_s13, [#allocation3]  }
  0x13   :  { %s259_s28 = scalar_lea.hbm %s384_s1, 2048 }
  0x14   :  { %p260_p8 = scmp.ne.s32.totalorder %s384_s1, %s259_s28  ;;  %p263_p9 = scmp.lt.u32.totalorder %s259_s28, %s384_s1 }
  0x16   :  { %p265_p10 = pnand %p263_p9, %p260_p8 }
  0x18   :  { %268 = shalt.err (!%p265_p10)
}
  0x19   :  { %s269_s6 = scalar_lea.vmem %s337_s15, 2048  ;;  %p274_p12 = scmp.lt.s32.totalorder %s337_s15, %s337_s15 }
  0x1a   :  { %p270_p11 = scmp.ne.s32.totalorder %s337_s15, %s269_s6  ;;  %p275_p13 = scmp.lt.s32.totalorder %s269_s6, %s269_s6 }
  0x1c   :  { %p276_p0 = por %p275_p13, %p274_p12 }
  0x1e   :  { %p277_p1 = pnand %p276_p0, %p270_p11 }
  0x20   :  { %280 = shalt.err (!%p277_p1)
}
  0x21   :  { %s311_s0 = smov 128   ;;  %s312_s7 = smov 8  }
  0x22   :  { %32 = dma.hbm_to_vmem [thread:$0]  %s384_s1, 2048, %s337_s15, [#allocation6], %s311_s0, %s311_s0, %s312_s7  }
  0x23   :  { %303 = dma.done.wait [#allocation3], 128  }
  0x24   :  { %304 = vsyncadd [#allocation3], 4294967168 }
  0x25   :  { %305 = dma.done.wait [#allocation6], 2048  }
  0x26   :  { %306 = vsyncadd [#allocation6], 4294965248  ;;  %v313_v0 = vmov 0.0|0.0   ;;  %vm314_vm0 = vmmov 0   ;;  %v315_v1 = vmov 0.0   ;;  %v42_v2 = vld [vmem:[#allocation5] sm:$0xff] }
  0x27   :  { %205 = vmatprep.subr.bf16.mxu0 %v313_v0  ;;  %202 = vmatprep.mubr.msk.f32.mxu0 %vm314_vm0, %v315_v1  ;;  %v43_v3 = vld [vmem:[#allocation5 + $0x8] sm:$0xff]  ;;  %v44_v4 = vld [vmem:[#allocation5 + $0x10] sm:$0xff]  ;;  %v45_v6 = vld [vmem:[#allocation5 + $0x18] sm:$0xff]  ;;  %s316_s11 = smov [#allocation7]  }
  0x28   :  { %v206_v5 = vpack.c.bf16 %v43_v3, %v42_v2  ;;  %v209_v7 = vpack.c.bf16 %v45_v6, %v44_v4  ;;  %v46_v8 = vld [vmem:[#allocation5 + $0x20] sm:$0xff]  ;;  %v47_v9 = vld [vmem:[#allocation5 + $0x28] sm:$0xff]  ;;  %v48_v11 = vld [vmem:[#allocation5 + $0x30] sm:$0xff]  ;;  %s142_s12 = sshll.u32 %s316_s11, 4  ;;  %s143_s12 = int_to_ptr.vmem [resolvable:$true] %s142_s12 }
  0x29   :  { %v212_v10 = vpack.c.bf16 %v47_v9, %v46_v8  ;;  %v49_v12 = vld [vmem:[#allocation5 + $0x38] sm:$0xff]  ;;  %v50_v14 = vld [vmem:[#allocation5 + $0x40] sm:$0xff]  ;;  %v51_v15 = vld [vmem:[#allocation5 + $0x48] sm:$0xff]  ;;  %s281_s13 = scalar_lea.vmem %s143_s12, 128  ;;  %p286_p3 = scmp.lt.s32.totalorder %s143_s12, %s143_s12 }
  0x2a   :  { %207 = vmatpush3.bf16.msra.mxu0 %v206_v5  ;;  %v215_v13 = vpack.c.bf16 %v49_v12, %v48_v11  ;;  %v218_v16 = vpack.c.bf16 %v51_v15, %v50_v14  ;;  %v52_v17 = vld [vmem:[#allocation5 + $0x50] sm:$0xff]  ;;  %v53_v18 = vld [vmem:[#allocation5 + $0x58] sm:$0xff]  ;;  %v54_v20 = vld [vmem:[#allocation5 + $0x60] sm:$0xff]  ;;  %p282_p2 = scmp.ne.s32.totalorder %s143_s12, %s281_s13  ;;  %p287_p4 = scmp.lt.s32.totalorder %s281_s13, %s281_s13 }
  0x2b   :  { %208 = vmatprep.subr.bf16.mxu0 %v313_v0  ;;  %v221_v19 = vpack.c.bf16 %v53_v18, %v52_v17  ;;  %v55_v21 = vld [vmem:[#allocation5 + $0x68] sm:$0xff]  ;;  %v56_v23 = vld [vmem:[#allocation5 + $0x70] sm:$0xff]  ;;  %v57_v24 = vld [vmem:[#allocation5 + $0x78] sm:$0xff] }
  0x2c   :  { %v224_v22 = vpack.c.bf16 %v55_v21, %v54_v20  ;;  %v227_v25 = vpack.c.bf16 %v57_v24, %v56_v23  ;;  %v41_v26 = vld [vmem:[#allocation2] sm:$0xff]  ;;  %p288_p5 = por %p287_p4, %p286_p3 }
  0x2d   :  { %v152_v27 = vld [vmem:[%s385_s2] ss:$0 sm:$0xff] }
  0x2e   :  { %210 = vmatpush3.bf16.msra.mxu0 %v209_v7  ;;  %p289_p6 = pnand %p288_p5, %p282_p2 }
  0x2f   :  { %211 = vmatprep.subr.bf16.mxu0 %v313_v0 }
  0x32   :  { %213 = vmatpush3.bf16.msra.mxu0 %v212_v10 }
  0x33   :  { %214 = vmatprep.subr.bf16.mxu0 %v313_v0 }
  0x36   :  { %216 = vmatpush3.bf16.msra.mxu0 %v215_v13 }
  0x37   :  { %217 = vmatprep.subr.bf16.mxu0 %v313_v0 }
  0x3a   :  { %219 = vmatpush3.bf16.msra.mxu0 %v218_v16 }
  0x3b   :  { %220 = vmatprep.subr.bf16.mxu0 %v313_v0 }
  0x3e   :  { %222 = vmatpush3.bf16.msra.mxu0 %v221_v19 }
  0x3f   :  { %223 = vmatprep.subr.bf16.mxu0 %v313_v0 }
  0x42   :  { %225 = vmatpush3.bf16.msra.mxu0 %v224_v22 }
  0x43   :  { %226 = vmatprep.subr.bf16.mxu0 %v313_v0 }
  0x46   :  { %228 = vmatpush3.bf16.msra.mxu0 %v227_v25 }
  0x49   :  { %203 = vmatmul.mubr.f32.vlgmr.msra.gmra.mrb[0].mxu0 %v41_v26 }
 0x11c   :  { %v131_v28 = vpop.f32.mrb[0].mxu0 }
 0x11d   :  { %v132_v29 = vadd.f32 %v152_v27, %v131_v28  ;;  %v204_v30 = vpop.f32.mrb[1].mxu0 }
 0x11f   :  { %135 = vst [vmem:[#allocation7] sm:$0xff] %v132_v29 }
 0x120   :  { %292 = shalt.err (!%p289_p6)
}
 0x121   :  { %s293_s16 = scalar_lea.hbm %s386_s3, 128 }
 0x122   :  { %p294_p7 = scmp.ne.s32.totalorder %s386_s3, %s293_s16  ;;  %p297_p8 = scmp.lt.u32.totalorder %s293_s16, %s386_s3 }
 0x124   :  { %p299_p9 = pnand %p297_p8, %p294_p7 }
 0x126   :  { %302 = shalt.err (!%p299_p9)
}
 0x127   :  { %145 = dma.vmem_to_hbm [thread:$0]  %s143_s12, 128, %s386_s3, [#allocation4]  }
 0x128   :  { %307 = dma.done.wait [#allocation4], 128  }
 0x129   :  { %308 = vsyncadd [#allocation4], 4294967168 }
 0x12a   :  { %149 = vsyncpa [#allocation3], 1 }
 0x12b   :  { %150 = vsyncpa [#allocation6], 1 }
 0x12c   :  { %151 = vsyncpa [#allocation4], 1 }

</bundles_post_ra>
